<compile_context>
chip_gen: v6e
topology: v6e:2x2x1
jax: 0.10.0
libtpu: 0.0.40
codegen_flags: <defaults>
</compile_context>

<pallas_src>
import functools

import jax
import jax.numpy as jnp
from jax.experimental import pallas as pl
from jax.experimental.pallas import tpu as pltpu


def _round_up(x: int, m: int) -> int:
    return (x + m - 1) // m * m


def _dqn_kernel(x_ref, w1_ref, b1_ref, w2_ref, b2_ref, w3_ref, b3_ref, out_ref):
    # fc1 + relu  (bf16 MXU operands, f32 accumulate)
    h1 = jnp.dot(x_ref[...], w1_ref[...], preferred_element_type=jnp.float32)
    h1 = jnp.maximum(h1 + b1_ref[...], 0.0)
    # fc2 + relu
    h2 = jnp.dot(h1.astype(jnp.bfloat16), w2_ref[...],
                 preferred_element_type=jnp.float32)
    h2 = jnp.maximum(h2 + b2_ref[...], 0.0)
    # fc3: Q-values into a lane-padded (TILE_B, 128*k) block (no activation)
    q = jnp.dot(h2.astype(jnp.bfloat16), w3_ref[...],
                preferred_element_type=jnp.float32)
    out_ref[...] = q + b3_ref[...]


@jax.jit
def dqn_forward(state, w1, b1, w2, b2, w3, b3):
    """Pallas-fused forward pass of DeepQNetwork.

    state: (B, input_dim) float32
    w1: (input_dim, fc1), b1: (1, fc1)
    w2: (fc1, fc2),       b2: (1, fc2)
    w3: (fc2, n_actions), b3: (1, n_actions)
    returns: (B, n_actions) float32
    """
    B, input_dim = state.shape
    n_actions = w3.shape[1]

    # Batch tiling: small batches use one (8*k) tile; large batches tile at 128.
    tile_b = min(128, _round_up(B, 8))
    b_pad = _round_up(B, tile_b)
    n_pad = _round_up(n_actions, 128)   # lane-dense output store

    # bf16 MXU operands (f32 accumulate inside the kernel).
    x = state.astype(jnp.bfloat16)
    if b_pad != B:
        x = jnp.pad(x, ((0, b_pad - B), (0, 0)))
    w1b = w1.astype(jnp.bfloat16)
    w2b = w2.astype(jnp.bfloat16)
    w3b = jnp.pad(w3, ((0, 0), (0, n_pad - n_actions))).astype(jnp.bfloat16)
    b3p = jnp.pad(b3, ((0, 0), (0, n_pad - n_actions)))

    def const_spec(arr):
        nd = arr.ndim
        return pl.BlockSpec(arr.shape, lambda i, _nd=nd: (0,) * _nd)

    out_padded = pl.pallas_call(
        _dqn_kernel,
        out_shape=jax.ShapeDtypeStruct((b_pad, n_pad), jnp.float32),
        grid_spec=pltpu.PrefetchScalarGridSpec(
            num_scalar_prefetch=0,
            grid=(b_pad // tile_b,),
            in_specs=[
                pl.BlockSpec((tile_b, input_dim), lambda i: (i, 0)),  # state tile
                const_spec(w1b), const_spec(b1),                      # resident weights
                const_spec(w2b), const_spec(b2),
                const_spec(w3b), const_spec(b3p),
            ],
            out_specs=pl.BlockSpec((tile_b, n_pad), lambda i: (i, 0)),
        ),
        compiler_params=pltpu.CompilerParams(
            dimension_semantics=("parallel",),   # megacore split on v7x
        ),
    )(x, w1b, b1, w2b, b2, w3b, b3p)

    return out_padded[:B, :n_actions]


def init_linear_params(key, fan_in, fan_out):
    """PyTorch nn.Linear default init: U(-1/sqrt(fan_in), 1/sqrt(fan_in))."""
    kw, kb = jax.random.split(key)
    bound = 1.0 / jnp.sqrt(jnp.float32(fan_in))
    # Store weight as (fan_in, fan_out) so forward is x @ W (== x @ W_pt.T).
    w = jax.random.uniform(kw, (fan_in, fan_out), jnp.float32, -bound, bound)
    b = jax.random.uniform(kb, (1, fan_out), jnp.float32, -bound, bound)
    return w, b


if __name__ == "__main__":
    # Module hyperparameters (small, consistent with the PyTorch module):
    # input_dims=(16,), fc1_dims=32, fc2_dims=32, n_actions=8, batch=8
    input_dim, fc1_dims, fc2_dims, n_actions = 16, 32, 32, 8
    batch = 8

    key = jax.random.PRNGKey(0)
    k_state, k1, k2, k3 = jax.random.split(key, 4)

    state = jax.random.normal(k_state, (batch, input_dim), jnp.float32)
    w1, b1 = init_linear_params(k1, input_dim, fc1_dims)
    w2, b2 = init_linear_params(k2, fc1_dims, fc2_dims)
    w3, b3 = init_linear_params(k3, fc2_dims, n_actions)

    actions = dqn_forward(state, w1, b1, w2, b2, w3, b3)
    actions = jax.block_until_ready(actions)
    assert actions.shape == (batch, n_actions)

    # Reference with the same bf16-operand / f32-accumulate math as the kernel.
    xb = state.astype(jnp.bfloat16)
    h1 = jax.nn.relu(jnp.dot(xb, w1.astype(jnp.bfloat16),
                             preferred_element_type=jnp.float32) + b1)
    h2 = jax.nn.relu(jnp.dot(h1.astype(jnp.bfloat16), w2.astype(jnp.bfloat16),
                             preferred_element_type=jnp.float32) + b2)
    ref_bf16 = jnp.dot(h2.astype(jnp.bfloat16), w3.astype(jnp.bfloat16),
                       preferred_element_type=jnp.float32) + b3
    assert jnp.allclose(actions, ref_bf16, atol=5e-3, rtol=5e-3)

    # Loose check against the full-f32 PyTorch-equivalent forward.
    h1f = jax.nn.relu(state @ w1 + b1)
    h2f = jax.nn.relu(h1f @ w2 + b2)
    ref_f32 = h2f @ w3 + b3
    assert jnp.allclose(actions, ref_f32, atol=3e-2, rtol=3e-2)

    print("KERNEL_OK")
</pallas_src>

<mosaic_0001>
module attributes {stable_mosaic.version = 11 : i64} {
  func.func @_dqn_kernel(%arg0: i32, %arg1: memref<8x16xbf16, #tpu.memory_space<vmem>>, %arg2: memref<16x32xbf16, #tpu.memory_space<vmem>>, %arg3: memref<1x32xf32, #tpu.memory_space<vmem>>, %arg4: memref<32x32xbf16, #tpu.memory_space<vmem>>, %arg5: memref<1x32xf32, #tpu.memory_space<vmem>>, %arg6: memref<32x128xbf16, #tpu.memory_space<vmem>>, %arg7: memref<1x128xf32, #tpu.memory_space<vmem>>, %arg8: memref<8x128xf32, #tpu.memory_space<vmem>>) attributes {dimension_semantics = [#tpu.dimension_semantics<parallel>], iteration_bounds = array<i64: 1>, scalar_prefetch = 0 : i64, scratch_operands = 0 : i64, tpu.core_type = #tpu.core_type<tc>, window_params = [{transform_indices = @transform_0, window_bounds = array<i64: 8, 16>}, {pipeline_mode = #tpu.pipeline_mode<synchronous>, transform_indices = @transform_1, window_bounds = array<i64: 16, 32>}, {pipeline_mode = #tpu.pipeline_mode<synchronous>, transform_indices = @transform_2, window_bounds = array<i64: 1, 32>}, {pipeline_mode = #tpu.pipeline_mode<synchronous>, transform_indices = @transform_3, window_bounds = array<i64: 32, 32>}, {pipeline_mode = #tpu.pipeline_mode<synchronous>, transform_indices = @transform_4, window_bounds = array<i64: 1, 32>}, {pipeline_mode = #tpu.pipeline_mode<synchronous>, transform_indices = @transform_5, window_bounds = array<i64: 32, 128>}, {pipeline_mode = #tpu.pipeline_mode<synchronous>, transform_indices = @transform_6, window_bounds = array<i64: 1, 128>}, {transform_indices = @transform_7, window_bounds = array<i64: 8, 128>}]} {
    %c0 = arith.constant 0 : index
    %c0_0 = arith.constant 0 : index
    %0 = vector.load %arg1[%c0, %c0_0] : memref<8x16xbf16, #tpu.memory_space<vmem>>, vector<8x16xbf16>
    %c0_1 = arith.constant 0 : index
    %c0_2 = arith.constant 0 : index
    %1 = vector.load %arg2[%c0_1, %c0_2] : memref<16x32xbf16, #tpu.memory_space<vmem>>, vector<16x32xbf16>
    %cst = arith.constant dense<0.000000e+00> : vector<8x32xf32>
    %2 = tpu.matmul %0, %1, %cst {dimension_numbers = #tpu.dot_dimension_numbers<[1], [0], [0], [1], [0, 0, 1, 1], [], []>} : vector<8x16xbf16>, vector<16x32xbf16>, vector<8x32xf32> -> vector<8x32xf32>
    %c0_3 = arith.constant 0 : index
    %c0_4 = arith.constant 0 : index
    %3 = vector.load %arg3[%c0_3, %c0_4] : memref<1x32xf32, #tpu.memory_space<vmem>>, vector<1x32xf32>
    %4 = vector.broadcast %3 : vector<1x32xf32> to vector<8x32xf32>
    %5 = arith.addf %2, %4 : vector<8x32xf32>
    %cst_5 = arith.constant 0.000000e+00 : f32
    %6 = vector.broadcast %cst_5 : f32 to vector<8x32xf32>
    %7 = arith.maximumf %5, %6 : vector<8x32xf32>
    %8 = arith.truncf %7 : vector<8x32xf32> to vector<8x32xbf16>
    %c0_6 = arith.constant 0 : index
    %c0_7 = arith.constant 0 : index
    %9 = vector.load %arg4[%c0_6, %c0_7] : memref<32x32xbf16, #tpu.memory_space<vmem>>, vector<32x32xbf16>
    %cst_8 = arith.constant dense<0.000000e+00> : vector<8x32xf32>
    %10 = tpu.matmul %8, %9, %cst_8 {dimension_numbers = #tpu.dot_dimension_numbers<[1], [0], [0], [1], [0, 0, 1, 1], [], []>} : vector<8x32xbf16>, vector<32x32xbf16>, vector<8x32xf32> -> vector<8x32xf32>
    %c0_9 = arith.constant 0 : index
    %c0_10 = arith.constant 0 : index
    %11 = vector.load %arg5[%c0_9, %c0_10] : memref<1x32xf32, #tpu.memory_space<vmem>>, vector<1x32xf32>
    %12 = vector.broadcast %11 : vector<1x32xf32> to vector<8x32xf32>
    %13 = arith.addf %10, %12 : vector<8x32xf32>
    %cst_11 = arith.constant 0.000000e+00 : f32
    %14 = vector.broadcast %cst_11 : f32 to vector<8x32xf32>
    %15 = arith.maximumf %13, %14 : vector<8x32xf32>
    %16 = arith.truncf %15 : vector<8x32xf32> to vector<8x32xbf16>
    %c0_12 = arith.constant 0 : index
    %c0_13 = arith.constant 0 : index
    %17 = vector.load %arg6[%c0_12, %c0_13] : memref<32x128xbf16, #tpu.memory_space<vmem>>, vector<32x128xbf16>
    %cst_14 = arith.constant dense<0.000000e+00> : vector<8x128xf32>
    %18 = tpu.matmul %16, %17, %cst_14 {dimension_numbers = #tpu.dot_dimension_numbers<[1], [0], [0], [1], [0, 0, 1, 1], [], []>} : vector<8x32xbf16>, vector<32x128xbf16>, vector<8x128xf32> -> vector<8x128xf32>
    %c0_15 = arith.constant 0 : index
    %c0_16 = arith.constant 0 : index
    %19 = vector.load %arg7[%c0_15, %c0_16] : memref<1x128xf32, #tpu.memory_space<vmem>>, vector<1x128xf32>
    %20 = vector.broadcast %19 : vector<1x128xf32> to vector<8x128xf32>
    %21 = arith.addf %18, %20 : vector<8x128xf32>
    %c0_17 = arith.constant 0 : index
    %c0_18 = arith.constant 0 : index
    %22 = vector.load %arg8[%c0_17, %c0_18] : memref<8x128xf32, #tpu.memory_space<vmem>>, vector<8x128xf32>
    tpu.vector_store %arg8[%c0_17, %c0_18], %21 {strides = array<i32>} : memref<8x128xf32, #tpu.memory_space<vmem>>, vector<8x128xf32>,
    return
  }
  func.func @transform_0(%arg0: i32) -> (i32, i32) {
    %c0_i32 = arith.constant 0 : i32
    %c0_i32_0 = arith.constant 0 : i32
    return %arg0, %c0_i32 : i32, i32
  }
  func.func @transform_1(%arg0: i32) -> (i32, i32) {
    %c0_i32 = arith.constant 0 : i32
    %c0_i32_0 = arith.constant 0 : i32
    %c0_i32_1 = arith.constant 0 : i32
    return %c0_i32, %c0_i32_0 : i32, i32
  }
  func.func @transform_2(%arg0: i32) -> (i32, i32) {
    %c0_i32 = arith.constant 0 : i32
    %c0_i32_0 = arith.constant 0 : i32
    %c0_i32_1 = arith.constant 0 : i32
    return %c0_i32, %c0_i32_0 : i32, i32
  }
  func.func @transform_3(%arg0: i32) -> (i32, i32) {
    %c0_i32 = arith.constant 0 : i32
    %c0_i32_0 = arith.constant 0 : i32
    %c0_i32_1 = arith.constant 0 : i32
    return %c0_i32, %c0_i32_0 : i32, i32
  }
  func.func @transform_4(%arg0: i32) -> (i32, i32) {
    %c0_i32 = arith.constant 0 : i32
    %c0_i32_0 = arith.constant 0 : i32
    %c0_i32_1 = arith.constant 0 : i32
    return %c0_i32, %c0_i32_0 : i32, i32
  }
  func.func @transform_5(%arg0: i32) -> (i32, i32) {
    %c0_i32 = arith.constant 0 : i32
    %c0_i32_0 = arith.constant 0 : i32
    %c0_i32_1 = arith.constant 0 : i32
    return %c0_i32, %c0_i32_0 : i32, i32
  }
  func.func @transform_6(%arg0: i32) -> (i32, i32) {
    %c0_i32 = arith.constant 0 : i32
    %c0_i32_0 = arith.constant 0 : i32
    %c0_i32_1 = arith.constant 0 : i32
    return %c0_i32, %c0_i32_0 : i32, i32
  }
  func.func @transform_7(%arg0: i32) -> (i32, i32) {
    %c0_i32 = arith.constant 0 : i32
    %c0_i32_0 = arith.constant 0 : i32
    return %arg0, %c0_i32 : i32, i32
  }
}

</mosaic_0001>

<bundles_post_ra>
// kernel: dqn_forward.1
= control target key start
LH: loop header
LB: loop body
LE: loop exit
PB: predicated region body
PF: predicated region fallthrough
CT: control target
= control target key end

     0   :  { %v311_v1 = vmov 0.0   ;;  %vm44_vm0 = vcmask 130048   ;;  %vm312_vm1 = vmmov 0   ;;  %s384_s0 = inlined_call_operand.vmem [shape: bf16[8,16], index: 0, kind: input, shape index: {}]   ;;  %s385_s1 = inlined_call_operand.vmem [shape: bf16[16,32], index: 1, kind: input, shape index: {}]   ;;  %s386_s2 = inlined_call_operand.vmem [shape: f32[1,32], index: 2, kind: input, shape index: {}]   ;;  %s387_s3 = inlined_call_operand.vmem [shape: bf16[32,32], index: 3, kind: input, shape index: {}]   ;;  %s388_s4 = inlined_call_operand.vmem [shape: f32[1,32], index: 4, kind: input, shape index: {}]   ;;  %s389_s5 = inlined_call_operand.vmem [shape: bf16[32,128], index: 5, kind: input, shape index: {}]   ;;  %s390_s6 = inlined_call_operand.vmem [shape: f32[1,128], index: 6, kind: input, shape index: {}]   ;;  %s391_s7 = inlined_call_operand.hbm [shape: f32[8,128], index: 7, kind: output, shape index: {}]  }
   0x1   :  { %v284_v0 = vld [vmem:[%s385_s1] sm:$0xff]   ;;  %259 = vmatprep.subr.bf16.mxu0 %v311_v1  ;;  %265 = vmatprep.subr.bf16.mxu1 %v311_v1 }
   0x2   :  { %v28_v2 = vld [vmem:[%s384_s0] sm:$0xf]  ;;  %260 = vmatpush3.bf16.msra.mxu0 %v284_v0  ;;  %261 = vmatprep.mubr.msk.bf16.mxu0 %vm312_vm1, %v311_v1 }
   0x3   :  { %269 = vmatprep.mubr.msk.bf16.mxu1 %vm312_vm1, %v311_v1  ;;  %273 = vmatprep.subr.bf16.mxu0 %v311_v1 }
   0x4   :  { %12 = vsyncpa [#allocation3], 0  ;;  %v285_v3 = vld [vmem:[%s387_s3 + $0x8] sm:$0xff]   ;;  %v286_v4 = vld [vmem:[%s387_s3] sm:$0xff]   ;;  %vm113_vm2 = vcmask 261120   ;;  %s313_s15 = smov [#allocation2]  }
   0x5   :  { %262 = vmatmul.mubr.msk.bf16.vlgmr.msra.gmra.mxu0 %vm44_vm0, %v28_v2  ;;  %266 = vmatpush3.bf16.msra.mxu1 %v285_v3  ;;  %v287_v5 = vld [vmem:[%s389_s5 + $0x8] sm:$0xff]   ;;  %v240_v6 = vld [vmem:[%s386_s2] ss:$0 sm:$0xff]  ;;  %s232_s16 = sshll.u32 %s313_s15, 4  ;;  %s233_s16 = int_to_ptr.vmem [resolvable:$true] %s232_s16 }
   0x6   :  { %277 = vmatprep.mubr.msk.bf16.mxu0 %vm312_vm1, %v311_v1  ;;  %267 = vmatprep.subr.bf16.mxu1 %v311_v1  ;;  %v288_v14 = vld [vmem:[%s389_s5] sm:$0xff]   ;;  %p294_p1 = scmp.lt.s32.totalorder %s233_s16, %s233_s16 }
   0x7   :  { %274 = vmatpush3.bf16.msra.mxu0 %v287_v5  ;;  %v243_v15 = vld [vmem:[%s388_s4] ss:$0 sm:$0xff]  ;;  %s289_s4 = scalar_lea.vmem %s233_s16, 128 }
   0x8   :  { %275 = vmatprep.subr.bf16.mxu0 %v311_v1  ;;  %v247_v23 = vld [vmem:[%s390_s6] ss:$0 sm:$0xff]  ;;  %p290_p0 = scmp.ne.s32.totalorder %s233_s16, %s289_s4  ;;  %p295_p2 = scmp.lt.s32.totalorder %s289_s4, %s289_s4 }
   0x9   :  { %268 = vmatpush3.bf16.msra.mxu1 %v286_v4 }
   0xa   :  { %p296_p3 = por %p295_p2, %p294_p1 }
   0xb   :  { %276 = vmatpush3.bf16.msra.mxu0 %v288_v14 }
   0xc   :  { %p297_p4 = pnand %p296_p3, %p290_p0 }
  0xc5   :  { %v82_v7 = vpop.f32.mrf.mxu0 }
  0xc6   :  { %v83_v8 = vadd.f32 %v240_v6, %v82_v7 }
  0xc7   :  { %v263_v9 = vpop.f32.mrf.mxu0 }
  0xc8   :  { %v88_v10 = vmax.f32 %v83_v8, 0.0 }
  0xc9   :  { %v85_v11 = vpop.f32.mrf.mxu0 }
  0xca   :  { %v89_v12 = vpack.c.bf16 %v88_v10, %v88_v10 }
  0xcb   :  { %v264_v13 = vpop.f32.mrf.mxu0 }
  0xcc   :  { %270 = vmatmul.mubr.msk.bf16.vlgmr.msra.gmra.mxu1 %vm113_vm2, %v89_v12 }
 0x18c   :  { %v151_v16 = vpop.f32.mrf.mxu1 }
 0x18d   :  { %v152_v17 = vadd.f32 %v243_v15, %v151_v16 }
 0x18e   :  { %v271_v18 = vpop.f32.mrf.mxu1 }
 0x18f   :  { %v157_v19 = vmax.f32 %v152_v17, 0.0 }
 0x190   :  { %v154_v20 = vpop.f32.mrf.mxu1 }
 0x191   :  { %v158_v21 = vpack.c.bf16 %v157_v19, %v157_v19 }
 0x192   :  { %v272_v22 = vpop.f32.mrf.mxu1 }
 0x193   :  { %278 = vmatmul.mubr.msk.bf16.vlgmr.msra.gmra.mxu0 %vm113_vm2, %v158_v21 }
 0x253   :  { %v219_v24 = vpop.f32.mrf.mxu0 }
 0x254   :  { %v220_v25 = vadd.f32 %v247_v23, %v219_v24 }
 0x255   :  { %v279_v26 = vpop.f32.mrf.mxu0 }
 0x256   :  { %225 = vst [vmem:[#allocation2] sm:$0xff] %v220_v25 }
 0x257   :  { %v222_v27 = vpop.f32.mrf.mxu0 }
 0x258   :  { %300 = shalt.err (!%p297_p4)
}
 0x259   :  { %235 = dma.vmem_to_hbm [thread:$0]  %s233_s16, 128, %s391_s7, [#allocation3]   ;;  %v280_v28 = vpop.f32.mrf.mxu0 }
 0x25a   :  { %309 = dma.done.wait [#allocation3], 128  }
 0x25b   :  { %310 = vsyncadd [#allocation3], 4294967168 }
 0x25c   :  { %239 = vsyncpa [#allocation3], 1 }

</bundles_post_ra>
